<compile_context>
chip_gen: v7x
topology: tpu7x:2x2x1
jax: 0.10.0
libtpu: 0.0.40
codegen_flags: <defaults>
</compile_context>

<pallas_src>
import jax
import jax.numpy as jnp
from jax.experimental import pallas as pl
from jax.experimental.pallas import tpu as pltpu


def _round_up(x: int, m: int) -> int:
    return (x + m - 1) // m * m


def _tpu_vmem_bytes() -> int:
    """Per-core VMEM capacity; conservative fallback if the query fails."""
    try:
        return int(pltpu.get_tpu_info().vmem_capacity_bytes)
    except Exception:
        return 64 << 20  # v7x-safe default


def _mlp_kernel(x_ref, w1_ref, b1_ref, w2_ref, b2_ref, out_ref):
    # hidden = relu(x @ W1 + b1); bf16 operands, f32 MXU accumulation.
    h = jnp.dot(x_ref[...], w1_ref[...], preferred_element_type=jnp.float32)
    h = jnp.maximum(h + b1_ref[...], 0.0)

    # logits = hidden @ W2 + b2.  b2's padded class columns hold -1e30 (and the
    # corresponding W2 columns are zero), so padded classes are masked here
    # with no extra iota/where work in the kernel.
    logits = jnp.dot(h.astype(w2_ref.dtype), w2_ref[...],
                     preferred_element_type=jnp.float32)
    logits = logits + b2_ref[...]

    # Numerically stable softmax along the class axis, all in f32.
    m = jnp.max(logits, axis=-1, keepdims=True)
    e = jnp.exp(logits - m)
    denom = jnp.sum(e, axis=-1, keepdims=True)
    # Exact reciprocal (approx=False): probabilities sum to 1 to f32 precision;
    # the epilogue is tiny relative to the matmuls so this costs nothing.
    out_ref[...] = (e * pl.reciprocal(denom, approx=False)).astype(out_ref.dtype)


def make_mlp(w1, b1, w2, b2):
    """Pad/cast parameters once and return a jitted forward(x) -> probs."""
    D, H = w1.shape
    C = w2.shape[1]

    # Lane-dense padded feature dims (multiples of 128).
    d_pad = _round_up(D, 128)
    h_pad = _round_up(H, 128)
    c_pad = _round_up(C, 128)

    bf16, f32 = jnp.bfloat16, jnp.float32

    # Hoisted, one-time weight preparation (bf16 weights, f32 biases).
    w1_p = jnp.zeros((d_pad, h_pad), bf16).at[:D, :H].set(w1.astype(bf16))
    b1_p = jnp.zeros((1, h_pad), f32).at[0, :H].set(b1.astype(f32).reshape(-1))
    w2_p = jnp.zeros((h_pad, c_pad), bf16).at[:H, :C].set(w2.astype(bf16))
    # Bake the softmax padding mask into the bias: padded columns -> -1e30.
    b2_p = jnp.full((1, c_pad), -1e30, f32).at[0, :C].set(
        b2.astype(f32).reshape(-1))

    # Generation-aware tile cap: bigger batch tiles where VMEM allows
    # (v5e/v6e: 128 MiB -> 1024), smaller on v7x (64 MiB/TC -> 512).
    vmem_cap = _tpu_vmem_bytes()
    if vmem_cap >= (96 << 20):
        tm_cap = 1024
    elif vmem_cap >= (48 << 20):
        tm_cap = 512
    else:
        tm_cap = 256

    @jax.jit
    def forward(x):
        B = x.shape[0]
        # Target a grid of >= 2 batch steps so v7x's two TensorCores can both
        # be used via dimension_semantics=("parallel",); cheap on 1-TC chips.
        tm = max(8, min(tm_cap, _round_up(pl.cdiv(B, 2), 8)))
        b_pad = _round_up(B, tm)
        grid = (b_pad // tm,)

        # Activation pad/cast fuses under jit (single bf16 pass over x).
        x_p = jnp.zeros((b_pad, d_pad), bf16).at[:B, :D].set(x.astype(bf16))

        # VMEM budget: double-buffered streamed tiles (x bf16 in, probs f32
        # out) + resident weights/biases (assume double-buffer allocation) +
        # headroom, clamped to ~75% of this generation's VMEM.
        streamed = 2 * tm * d_pad * 2 + 2 * tm * c_pad * 4
        resident = 2 * ((d_pad * h_pad + h_pad * c_pad) * 2
                        + (h_pad + c_pad) * 4)
        vmem_limit = int(min(max(streamed + resident + (8 << 20), 32 << 20),
                             int(vmem_cap * 0.75)))

        out_padded = pl.pallas_call(
            _mlp_kernel,
            out_shape=jax.ShapeDtypeStruct((b_pad, c_pad), jnp.float32),
            grid_spec=pl.GridSpec(
                grid=grid,
                in_specs=[
                    # Activations: streamed per batch tile (auto-pipelined DMA).
                    pl.BlockSpec((tm, d_pad), lambda i: (i, 0)),
                    # Weights / biases: constant index_map -> VMEM-resident.
                    pl.BlockSpec((d_pad, h_pad), lambda i: (0, 0)),
                    pl.BlockSpec((1, h_pad), lambda i: (0, 0)),
                    pl.BlockSpec((h_pad, c_pad), lambda i: (0, 0)),
                    pl.BlockSpec((1, c_pad), lambda i: (0, 0)),
                ],
                out_specs=pl.BlockSpec((tm, c_pad), lambda i: (i, 0)),
            ),
            compiler_params=pltpu.CompilerParams(
                dimension_semantics=("parallel",),
                vmem_limit_bytes=vmem_limit,
            ),
        )(x_p, w1_p, b1_p, w2_p, b2_p)

        # Slice the lane-dense padded slab back to (B, C); fuses under jit.
        return out_padded[:B, :C]

    return forward


if __name__ == "__main__":
    input_dim, hidden_dim, num_class = 4, 5, 2
    batch = 3

    key = jax.random.PRNGKey(0)
    kx, k1, k2, k3, k4 = jax.random.split(key, 5)

    # Deterministic example inputs / parameters (shapes from MLP.__init__).
    x = jax.random.uniform(kx, (batch, input_dim), dtype=jnp.float32)  # torch.rand
    w1 = jax.random.normal(k1, (input_dim, hidden_dim), jnp.float32) * 0.1
    b1 = jax.random.normal(k2, (hidden_dim,), jnp.float32) * 0.1
    w2 = jax.random.normal(k3, (hidden_dim, num_class), jnp.float32) * 0.1
    b2 = jax.random.normal(k4, (num_class,), jnp.float32) * 0.1

    mlp = make_mlp(w1, b1, w2, b2)
    probs = jax.block_until_ready(mlp(x))

    # Reference check in plain JAX (bf16 matmul operands -> ~1e-2 tolerance).
    h_ref = jnp.maximum(x @ w1 + b1, 0.0)
    logits_ref = h_ref @ w2 + b2
    probs_ref = jax.nn.softmax(logits_ref, axis=1)
    assert probs.shape == (batch, num_class)
    assert jnp.allclose(probs, probs_ref, atol=2e-2), "mismatch vs reference"
    assert jnp.allclose(jnp.sum(probs, axis=1), 1.0, atol=1e-3)

    print("KERNEL_OK")
</pallas_src>

<mosaic_0001>
module attributes {stable_mosaic.version = 11 : i64} {
  func.func @_mlp_kernel(%arg0: i32, %arg1: memref<8x128xbf16, #tpu.memory_space<vmem>>, %arg2: memref<128x128xbf16, #tpu.memory_space<vmem>>, %arg3: memref<1x128xf32, #tpu.memory_space<vmem>>, %arg4: memref<128x128xbf16, #tpu.memory_space<vmem>>, %arg5: memref<1x128xf32, #tpu.memory_space<vmem>>, %arg6: memref<8x128xf32, #tpu.memory_space<vmem>>) attributes {dimension_semantics = [#tpu.dimension_semantics<parallel>], iteration_bounds = array<i64: 1>, scalar_prefetch = 0 : i64, scratch_operands = 0 : i64, tpu.core_type = #tpu.core_type<tc>, window_params = [{transform_indices = @transform_0, window_bounds = array<i64: 8, 128>}, {pipeline_mode = #tpu.pipeline_mode<synchronous>, transform_indices = @transform_1, window_bounds = array<i64: 128, 128>}, {pipeline_mode = #tpu.pipeline_mode<synchronous>, transform_indices = @transform_2, window_bounds = array<i64: 1, 128>}, {pipeline_mode = #tpu.pipeline_mode<synchronous>, transform_indices = @transform_3, window_bounds = array<i64: 128, 128>}, {pipeline_mode = #tpu.pipeline_mode<synchronous>, transform_indices = @transform_4, window_bounds = array<i64: 1, 128>}, {transform_indices = @transform_5, window_bounds = array<i64: 8, 128>}]} {
    %c0 = arith.constant 0 : index
    %c0_0 = arith.constant 0 : index
    %0 = vector.load %arg1[%c0, %c0_0] : memref<8x128xbf16, #tpu.memory_space<vmem>>, vector<8x128xbf16>
    %c0_1 = arith.constant 0 : index
    %c0_2 = arith.constant 0 : index
    %1 = vector.load %arg2[%c0_1, %c0_2] : memref<128x128xbf16, #tpu.memory_space<vmem>>, vector<128x128xbf16>
    %cst = arith.constant dense<0.000000e+00> : vector<8x128xf32>
    %2 = tpu.matmul %0, %1, %cst {dimension_numbers = #tpu.dot_dimension_numbers<[1], [0], [0], [1], [0, 0, 1, 1], [], []>} : vector<8x128xbf16>, vector<128x128xbf16>, vector<8x128xf32> -> vector<8x128xf32>
    %c0_3 = arith.constant 0 : index
    %c0_4 = arith.constant 0 : index
    %3 = vector.load %arg3[%c0_3, %c0_4] : memref<1x128xf32, #tpu.memory_space<vmem>>, vector<1x128xf32>
    %4 = vector.broadcast %3 : vector<1x128xf32> to vector<8x128xf32>
    %5 = arith.addf %2, %4 : vector<8x128xf32>
    %cst_5 = arith.constant 0.000000e+00 : f32
    %6 = vector.broadcast %cst_5 : f32 to vector<8x128xf32>
    %7 = arith.maximumf %5, %6 : vector<8x128xf32>
    %8 = arith.truncf %7 : vector<8x128xf32> to vector<8x128xbf16>
    %c0_6 = arith.constant 0 : index
    %c0_7 = arith.constant 0 : index
    %9 = vector.load %arg4[%c0_6, %c0_7] : memref<128x128xbf16, #tpu.memory_space<vmem>>, vector<128x128xbf16>
    %cst_8 = arith.constant dense<0.000000e+00> : vector<8x128xf32>
    %10 = tpu.matmul %8, %9, %cst_8 {dimension_numbers = #tpu.dot_dimension_numbers<[1], [0], [0], [1], [0, 0, 1, 1], [], []>} : vector<8x128xbf16>, vector<128x128xbf16>, vector<8x128xf32> -> vector<8x128xf32>
    %c0_9 = arith.constant 0 : index
    %c0_10 = arith.constant 0 : index
    %11 = vector.load %arg5[%c0_9, %c0_10] : memref<1x128xf32, #tpu.memory_space<vmem>>, vector<1x128xf32>
    %12 = vector.broadcast %11 : vector<1x128xf32> to vector<8x128xf32>
    %13 = arith.addf %10, %12 : vector<8x128xf32>
    %cst_11 = arith.constant dense<0xFF800000> : vector<8xf32>
    %14 = vector.multi_reduction <maximumf>, %13, %cst_11 [1] : vector<8x128xf32> to vector<8xf32>
    %15 = vector.shape_cast %14 : vector<8xf32> to vector<8x1xf32>
    %16 = vector.broadcast %15 : vector<8x1xf32> to vector<8x128xf32>
    %17 = arith.subf %13, %16 : vector<8x128xf32>
    %18 = math.exp %17 : vector<8x128xf32>
    %cst_12 = arith.constant dense<0.000000e+00> : vector<8xf32>
    %19 = vector.multi_reduction <add>, %18, %cst_12 [1] : vector<8x128xf32> to vector<8xf32>
    %20 = vector.shape_cast %19 : vector<8xf32> to vector<8x1xf32>
    %21 = tpu.reciprocal %20 : vector<8x1xf32> -> vector<8x1xf32>
    %22 = vector.broadcast %21 : vector<8x1xf32> to vector<8x128xf32>
    %23 = arith.mulf %18, %22 : vector<8x128xf32>
    %c0_13 = arith.constant 0 : index
    %c0_14 = arith.constant 0 : index
    %24 = vector.load %arg6[%c0_13, %c0_14] : memref<8x128xf32, #tpu.memory_space<vmem>>, vector<8x128xf32>
    tpu.vector_store %arg6[%c0_13, %c0_14], %23 {strides = array<i32>} : memref<8x128xf32, #tpu.memory_space<vmem>>, vector<8x128xf32>,
    return
  }
  func.func @transform_0(%arg0: i32) -> (i32, i32) {
    %c0_i32 = arith.constant 0 : i32
    %c0_i32_0 = arith.constant 0 : i32
    return %arg0, %c0_i32 : i32, i32
  }
  func.func @transform_1(%arg0: i32) -> (i32, i32) {
    %c0_i32 = arith.constant 0 : i32
    %c0_i32_0 = arith.constant 0 : i32
    %c0_i32_1 = arith.constant 0 : i32
    return %c0_i32, %c0_i32_0 : i32, i32
  }
  func.func @transform_2(%arg0: i32) -> (i32, i32) {
    %c0_i32 = arith.constant 0 : i32
    %c0_i32_0 = arith.constant 0 : i32
    %c0_i32_1 = arith.constant 0 : i32
    return %c0_i32, %c0_i32_0 : i32, i32
  }
  func.func @transform_3(%arg0: i32) -> (i32, i32) {
    %c0_i32 = arith.constant 0 : i32
    %c0_i32_0 = arith.constant 0 : i32
    %c0_i32_1 = arith.constant 0 : i32
    return %c0_i32, %c0_i32_0 : i32, i32
  }
  func.func @transform_4(%arg0: i32) -> (i32, i32) {
    %c0_i32 = arith.constant 0 : i32
    %c0_i32_0 = arith.constant 0 : i32
    %c0_i32_1 = arith.constant 0 : i32
    return %c0_i32, %c0_i32_0 : i32, i32
  }
  func.func @transform_5(%arg0: i32) -> (i32, i32) {
    %c0_i32 = arith.constant 0 : i32
    %c0_i32_0 = arith.constant 0 : i32
    return %arg0, %c0_i32 : i32, i32
  }
}

</mosaic_0001>

<bundles_post_ra>
// kernel: forward.1
= control target key start
LH: loop header
LB: loop body
LE: loop exit
PB: predicated region body
PF: predicated region fallthrough
CT: control target
= control target key end

     0   :  { %10 = vsyncpa [#allocation3], 0  ;;  %s512_s0 = inlined_call_operand.vmem [shape: bf16[8,128], index: 0, kind: input, shape index: {}]   ;;  %s513_s1 = inlined_call_operand.hbm [shape: bf16[128,128], index: 1, kind: input, shape index: {}]   ;;  %s514_s2 = inlined_call_operand.vmem [shape: f32[1,128], index: 2, kind: input, shape index: {}]   ;;  %s515_s3 = inlined_call_operand.hbm [shape: bf16[128,128], index: 3, kind: input, shape index: {}]   ;;  %s516_s4 = inlined_call_operand.vmem [shape: f32[1,128], index: 4, kind: input, shape index: {}]   ;;  %s517_s5 = inlined_call_operand.vmem [shape: f32[8,128], index: 5, kind: output, shape index: {}]  }
   0x1   :  { %11 = vsyncpa [#allocation5], 0  ;;  %s440_s18 = smov [#allocation2]   ;;  %s392_s22 = scalar_lea.hbm %s513_s1, 1024 }
   0x2   :  { %s19_s19 = sshll.u32 %s440_s18, 4  ;;  %p393_p0 = scmp.ne.s32.totalorder %s513_s1, %s392_s22  ;;  %s20_s19 = int_to_ptr.vmem [resolvable:$true] %s19_s19 }
   0x3   :  { %p396_p1 = scmp.lt.u32.totalorder %s392_s22, %s513_s1 }
   0x5   :  { %p398_p2 = pnand %p396_p1, %p393_p0 }
   0x7   :  { %401 = shalt.err (!%p398_p2)
}
   0x8   :  { %s402_s27 = scalar_lea.vmem %s20_s19, 1024  ;;  %p407_p4 = scmp.lt.s32.totalorder %s20_s19, %s20_s19 }
   0x9   :  { %p403_p3 = scmp.ne.s32.totalorder %s20_s19, %s402_s27  ;;  %p408_p5 = scmp.lt.s32.totalorder %s402_s27, %s402_s27 }
   0xb   :  { %p409_p6 = por %p408_p5, %p407_p4 }
   0xd   :  { %p410_p7 = pnand %p409_p6, %p403_p3 }
   0xf   :  { %413 = shalt.err (!%p410_p7)
}
  0x10   :  { %s441_s28 = smov 64   ;;  %s442_s29 = smov 4  }
  0x11   :  { %25 = dma.hbm_to_vmem [thread:$0]  %s513_s1, 1024, %s20_s19, [#allocation3], %s441_s28, %s441_s28, %s442_s29  }
  0x12   :  { %s443_s7 = smov [#allocation4]   ;;  %s414_s11 = scalar_lea.hbm %s515_s3, 1024 }
  0x13   :  { %s33_s8 = sshll.u32 %s443_s7, 4  ;;  %p415_p8 = scmp.ne.s32.totalorder %s515_s3, %s414_s11  ;;  %s34_s8 = int_to_ptr.vmem [resolvable:$true] %s33_s8 }
  0x14   :  { %p418_p9 = scmp.lt.u32.totalorder %s414_s11, %s515_s3 }
  0x16   :  { %p420_p10 = pnand %p418_p9, %p415_p8 }
  0x18   :  { %423 = shalt.err (!%p420_p10)
}
  0x19   :  { %s424_s16 = scalar_lea.vmem %s34_s8, 1024  ;;  %p429_p12 = scmp.lt.s32.totalorder %s34_s8, %s34_s8 }
  0x1a   :  { %p425_p11 = scmp.ne.s32.totalorder %s34_s8, %s424_s16  ;;  %p430_p13 = scmp.lt.s32.totalorder %s424_s16, %s424_s16 }
  0x1c   :  { %p431_p0 = por %p430_p13, %p429_p12 }
  0x1e   :  { %p432_p1 = pnand %p431_p0, %p425_p11 }
  0x20   :  { %435 = shalt.err (!%p432_p1)
}
  0x21   :  { %39 = dma.hbm_to_vmem [thread:$0]  %s515_s3, 1024, %s34_s8, [#allocation5], %s441_s28, %s441_s28, %s442_s29  }
  0x22   :  { %436 = dma.done.wait [#allocation3], 1024  }
  0x23   :  { %437 = vsyncadd [#allocation3], 4294966272 }
  0x24   :  { %438 = dma.done.wait [#allocation5], 1024  }
  0x25   :  { %439 = vsyncadd [#allocation5], 4294966272  ;;  %v444_v0 = vmov 0.0   ;;  %vm445_vm0 = vmmov 0   ;;  %v372_v1 = vld [vmem:[#allocation2] sm:$0xff]   ;;  %v373_v2 = vld [vmem:[#allocation2 + $0x8] sm:$0xff]  }
  0x26   :  { %326 = vmatprep.subr.bf16.mxu0 %v444_v0  ;;  %342 = vmatprep.mubr.msk.bf16.mxu0 %vm445_vm0, %v444_v0  ;;  %v374_v3 = vld [vmem:[#allocation2 + $0x10] sm:$0xff]   ;;  %v380_v4 = vld [vmem:[#allocation4] sm:$0xff]   ;;  %v375_v5 = vld [vmem:[#allocation2 + $0x18] sm:$0xff]  }
  0x27   :  { %346 = vmatprep.subr.bf16.mxu1 %v444_v0  ;;  %362 = vmatprep.mubr.msk.bf16.mxu1 %vm445_vm0, %v444_v0  ;;  %v381_v6 = vld [vmem:[#allocation4 + $0x8] sm:$0xff]   ;;  %v376_v7 = vld [vmem:[#allocation2 + $0x20] sm:$0xff]   ;;  %v382_v8 = vld [vmem:[#allocation4 + $0x10] sm:$0xff]  }
  0x28   :  { %327 = vmatpush3.bf16.msra.mxu0 %v372_v1  ;;  %347 = vmatpush3.bf16.msra.mxu1 %v380_v4  ;;  %v377_v9 = vld [vmem:[#allocation2 + $0x28] sm:$0xff]   ;;  %v383_v10 = vld [vmem:[#allocation4 + $0x18] sm:$0xff]   ;;  %v378_v11 = vld [vmem:[#allocation2 + $0x30] sm:$0xff]  }
  0x29   :  { %328 = vmatprep.subr.bf16.mxu0 %v444_v0  ;;  %348 = vmatprep.subr.bf16.mxu1 %v444_v0  ;;  %v384_v12 = vld [vmem:[#allocation4 + $0x20] sm:$0xff]   ;;  %v379_v13 = vld [vmem:[#allocation2 + $0x38] sm:$0xff]   ;;  %v385_v14 = vld [vmem:[#allocation4 + $0x28] sm:$0xff]  }
  0x2a   :  { %v49_v15 = vld [vmem:[%s512_s0] sm:$0xf]  ;;  %v386_v16 = vld [vmem:[#allocation4 + $0x30] sm:$0xff]   ;;  %v387_v17 = vld [vmem:[#allocation4 + $0x38] sm:$0xff]  }
  0x2b   :  { %v290_v18 = vld [vmem:[%s514_s2] ss:$0 sm:$0xff] }
  0x2c   :  { %329 = vmatpush3.bf16.msra.mxu0 %v373_v2  ;;  %349 = vmatpush3.bf16.msra.mxu1 %v381_v6  ;;  %v299_v26 = vld [vmem:[%s516_s4] ss:$0 sm:$0xff] }
  0x2d   :  { %330 = vmatprep.subr.bf16.mxu0 %v444_v0  ;;  %350 = vmatprep.subr.bf16.mxu1 %v444_v0 }
  0x30   :  { %331 = vmatpush3.bf16.msra.mxu0 %v374_v3  ;;  %351 = vmatpush3.bf16.msra.mxu1 %v382_v8 }
  0x31   :  { %332 = vmatprep.subr.bf16.mxu0 %v444_v0  ;;  %352 = vmatprep.subr.bf16.mxu1 %v444_v0 }
  0x34   :  { %333 = vmatpush3.bf16.msra.mxu0 %v375_v5  ;;  %353 = vmatpush3.bf16.msra.mxu1 %v383_v10 }
  0x35   :  { %334 = vmatprep.subr.bf16.mxu0 %v444_v0  ;;  %354 = vmatprep.subr.bf16.mxu1 %v444_v0 }
  0x38   :  { %335 = vmatpush3.bf16.msra.mxu0 %v376_v7  ;;  %355 = vmatpush3.bf16.msra.mxu1 %v384_v12 }
  0x39   :  { %336 = vmatprep.subr.bf16.mxu0 %v444_v0  ;;  %356 = vmatprep.subr.bf16.mxu1 %v444_v0 }
  0x3c   :  { %337 = vmatpush3.bf16.msra.mxu0 %v377_v9  ;;  %357 = vmatpush3.bf16.msra.mxu1 %v385_v14 }
  0x3d   :  { %338 = vmatprep.subr.bf16.mxu0 %v444_v0  ;;  %358 = vmatprep.subr.bf16.mxu1 %v444_v0 }
  0x40   :  { %339 = vmatpush3.bf16.msra.mxu0 %v378_v11  ;;  %359 = vmatpush3.bf16.msra.mxu1 %v386_v16 }
  0x41   :  { %340 = vmatprep.subr.bf16.mxu0 %v444_v0  ;;  %360 = vmatprep.subr.bf16.mxu1 %v444_v0 }
  0x44   :  { %341 = vmatpush3.bf16.msra.mxu0 %v379_v13  ;;  %361 = vmatpush3.bf16.msra.mxu1 %v387_v17 }
  0x47   :  { %343 = vmatmul.mubr.bf16.vlgmr.msra.gmra.mrb[0].mxu0 %v49_v15 }
 0x11a   :  { %v155_v19 = vpop.f32.mrb[0].mxu0 }
 0x11b   :  { %v156_v20 = vadd.f32 %v290_v18, %v155_v19  ;;  %v344_v21 = vpop.f32.mrb[1].mxu0 }
 0x11c   :  { %v158_v22 = vpop.f32.mrb[2].mxu0 }
 0x11d   :  { %v161_v23 = vmax.f32 %v156_v20, 0.0  ;;  %v345_v24 = vpop.f32.mrb[3].mxu0 }
 0x11f   :  { %v162_v25 = vpack.c.bf16 %v161_v23, %v161_v23 }
 0x121   :  { %363 = vmatmul.mubr.bf16.vlgmr.msra.gmra.mrb[0].mxu1 %v162_v25 }
 0x1f4   :  { %v268_v27 = vpop.f32.mrb[0].mxu1 }
 0x1f5   :  { %v269_v28 = vadd.f32 %v299_v26, %v268_v27  ;;  %v364_v29 = vpop.f32.mrb[1].mxu1 }
 0x1f6   :  { %v271_v30 = vpop.f32.mrb[2].mxu1 }
 0x1f7   :  { %274 = vmax.xlane.f32.xlu0 %v269_v28  ;;  %v365_v31 = vpop.f32.mrb[3].mxu1 }
 0x284   :  { %v275_v32 = vpop.xlane.xlu0 %274 }
 0x285   :  { %v276_v33 = vsub.f32 %v269_v28, %v275_v32 }
 0x287   :  { %v277_v34 = vmul.f32 1.442695, %v276_v33 }
 0x289   :  { %388 = vpow2.f32 %v277_v34 }
 0x293   :  { %v389_v35 = vpop.eup %388 }
 0x294   :  { %279 = vadd.xlane.f32.xlu0 %v389_v35 }
 0x321   :  { %v280_v36 = vpop.xlane.xlu0 %279 }
 0x322   :  { %390 = vrcp.f32 %v280_v36 }
 0x32c   :  { %v391_v37 = vpop.eup %390 }
 0x32d   :  { %v282_v38 = vmul.f32 %v391_v37, %v389_v35 }
 0x32f   :  { %283 = vst [vmem:[%s517_s5] sm:$0xff] %v282_v38 }
 0x330   :  { %288 = vsyncpa [#allocation3], 1 }
 0x331   :  { %289 = vsyncpa [#allocation5], 1 }

</bundles_post_ra>
